<compile_context>
chip_gen: v5e
topology: v5e:2x2
jax: 0.10.0
libtpu: 0.0.40
codegen_flags: <defaults>
</compile_context>

<pallas_src>
import jax
import jax.numpy as jnp
import numpy as np
from jax.experimental import pallas as pl
from jax.experimental.pallas import tpu as pltpu

C_IN = 12          # dilation_channels
C_RES = 24         # residual_channels
C_OUT = 12         # end_conv out channels
ORDER = 2
BN_EPS = 1e-5


def _round_up(x, m):
    return ((x + m - 1) // m) * m


def agcn_kernel(x_ref, k_ref, b_ref, o_ref):
    # x_ref: (TB, C_IN*V)  [stream dtype]   k_ref: (C_IN*V, C_OUT*V) [stream dtype]
    # b_ref: (1, C_OUT*V)  f32              o_ref: (TB, C_OUT*V)     f32
    o_ref[...] = (
        jnp.dot(x_ref[...], k_ref[...], preferred_element_type=jnp.float32)
        + b_ref[...]
    ).astype(o_ref.dtype)


def _fold_constants(adp, w_mlp, b_mlp, bn_gamma, bn_beta, bn_mean, bn_var,
                    w_end, b_end, V):
    """Eval-mode constant folding of gcn-mlp + BN + end_conv into (K, b_row)."""
    f32 = jnp.float32
    hp = jax.lax.Precision.HIGHEST

    scale = bn_gamma * jax.lax.rsqrt(bn_var + BN_EPS)                    # (24,)
    shift = bn_beta - bn_mean * scale                                    # (24,)
    w_fold = jnp.dot(w_end * scale[None, :], w_mlp, precision=hp)        # (12, 36)
    b_eff = jnp.dot(w_end, scale * b_mlp + shift, precision=hp) + b_end  # (12,)

    A = jnp.maximum(adp, 0.0).astype(f32)                                # relu(adp)
    A2 = jnp.dot(A, A, precision=hp)
    mats = jnp.stack([jnp.eye(V, dtype=f32), A, A2])                     # (3, V, V)
    w_k = w_fold.reshape(C_OUT, ORDER + 1, C_IN)                         # [o, k, c]
    # big_w[(c, v), (o, w)] = sum_k w_k[o, k, c] * mats[k, v, w]
    big_w = jnp.einsum('okc,kvw->cvow', w_k, mats, precision=hp)
    big_w = big_w.reshape(C_IN * V, C_OUT * V)                           # (12V, 12V)
    b_row = jnp.repeat(b_eff, V)[None, :]                                # (1, 12V)
    return big_w, b_row


def agcn_forward(x, adp, w_mlp, b_mlp, bn_gamma, bn_beta, bn_mean, bn_var,
                 w_end, b_end, *, block_n=2048, stream_dtype=jnp.bfloat16,
                 min_pallas_rows=512):
    N, C, V = x.shape
    assert C == C_IN
    f32 = jnp.float32
    kin, kout = C_IN * V, C_OUT * V

    big_w, b_row = _fold_constants(adp, w_mlp, b_mlp, bn_gamma, bn_beta,
                                   bn_mean, bn_var, w_end, b_end, V)

    # Flatten (N, 12, V) -> (N, 12*V).  If the producer already keeps x flat
    # (and the consumer accepts flat output), drop both reshapes - they are the
    # only remaining wrapper relayout passes.
    x2 = x.reshape(N, kin)
    xs = x2.astype(stream_dtype)          # bf16 streaming operand (default)
    ks = big_w.astype(stream_dtype)
    b_row = b_row.astype(f32)             # bias + accumulation stay f32

    if N < min_pallas_rows:
        # Small-N fast path: kernel-launch + per-step overhead would dominate;
        # let XLA's fused GEMM handle it.
        out2 = jnp.dot(xs, ks, preferred_element_type=f32) + b_row
        return out2.reshape(N, C_OUT, V)

    # ---- batch tiling ----
    block_n = _round_up(max(block_n, 8), 8)            # tb must be a multiple of 8
    tb = min(block_n, _round_up(N, 8))
    if N >= 16:
        # Keep >= 2 "parallel" grid steps so both v7x TensorCores are fed
        # (no effect beyond tile size on single-TC v5e/v6e).
        tb = min(tb, _round_up(pl.cdiv(N, 2), 8))
    grid = (pl.cdiv(N, tb),)
    # No jnp.pad / [:N] slice: the ragged last block reads don't-care rows and
    # its writeback is masked; rows are independent so this is safe.

    isz = jnp.dtype(stream_dtype).itemsize
    cost = pl.CostEstimate(
        flops=2 * N * kin * kout,
        transcendentals=0,
        bytes_accessed=N * kin * isz + kin * kout * isz + N * kout * 4 + kout * 4)

    out2 = pl.pallas_call(
        agcn_kernel,
        out_shape=jax.ShapeDtypeStruct((N, kout), f32),
        grid=grid,
        in_specs=[
            pl.BlockSpec((tb, kin), lambda i: (i, 0)),     # streamed x rows
            pl.BlockSpec((kin, kout), lambda i: (0, 0)),   # folded weight, resident
            pl.BlockSpec((1, kout), lambda i: (0, 0)),     # folded bias, resident
        ],
        out_specs=pl.BlockSpec((tb, kout), lambda i: (i, 0)),
        compiler_params=pltpu.CompilerParams(
            dimension_semantics=("parallel",)),
        cost_estimate=cost,
    )(xs, ks, b_row)

    return out2.reshape(N, C_OUT, V)


def agcn_reference(x, adp, w_mlp, b_mlp, bn_gamma, bn_beta, bn_mean, bn_var,
                   w_end, b_end):
    """Pure-JAX reference mirroring the PyTorch forward (eval mode), unfused."""
    hp = jax.lax.Precision.HIGHEST
    A = jnp.maximum(adp, 0.0)
    x0 = x                                                   # (N, C, V)
    x1 = jnp.einsum('ncv,vw->ncw', x0, A, precision=hp)
    x2 = jnp.einsum('ncv,vw->ncw', x1, A, precision=hp)
    h = jnp.concatenate([x0, x1, x2], axis=1)                # (N, 36, V)
    h = jnp.einsum('oc,ncv->nov', w_mlp, h, precision=hp) + b_mlp[None, :, None]
    scale = bn_gamma / jnp.sqrt(bn_var + BN_EPS)
    h = (h - bn_mean[None, :, None]) * scale[None, :, None] + bn_beta[None, :, None]
    out = jnp.einsum('oc,ncv->nov', w_end, h, precision=hp) + b_end[None, :, None]
    return out


if __name__ == "__main__":
    N, V = 20, 16
    key = jax.random.PRNGKey(0)
    ks = jax.random.split(key, 8)

    x = jax.random.normal(ks[0], (N, C_IN, V), dtype=jnp.float32)
    aptinit = jax.random.normal(ks[1], (V, V), dtype=jnp.float32)  # self.adp param

    # Conv2d(36, 24, 1x1) weights (squeezed to (24, 36)) + bias
    w_mlp = jax.random.normal(ks[2], (C_RES, (ORDER + 1) * C_IN), dtype=jnp.float32) * 0.1
    b_mlp = jax.random.normal(ks[3], (C_RES,), dtype=jnp.float32) * 0.1
    # BatchNorm2d(24) params / running stats (eval mode)
    bn_gamma = jnp.ones((C_RES,), dtype=jnp.float32) * 1.1
    bn_beta = jnp.ones((C_RES,), dtype=jnp.float32) * 0.05
    bn_mean = jnp.ones((C_RES,), dtype=jnp.float32) * 0.02
    bn_var = jnp.ones((C_RES,), dtype=jnp.float32) * 0.9
    # Conv2d(24, 12, 1x1) weights + bias
    w_end = jax.random.normal(ks[4], (C_OUT, C_RES), dtype=jnp.float32) * 0.1
    b_end = jax.random.normal(ks[5], (C_OUT,), dtype=jnp.float32) * 0.1

    params = (aptinit, w_mlp, b_mlp, bn_gamma, bn_beta, bn_mean, bn_var,
              w_end, b_end)
    ref = agcn_reference(x, *params)

    # 1) f32 Pallas path: min_pallas_rows=0 forces the kernel, block_n=8 so the
    #    tiny test still hits multiple grid steps + the ragged masked tail
    #    block (rows [16:20) of a [16:24) block).  Tight tolerance checks the
    #    constant folding + kernel exactly.
    out_f32 = jax.block_until_ready(
        agcn_forward(x, *params, block_n=8, stream_dtype=jnp.float32,
                     min_pallas_rows=0))
    np.testing.assert_allclose(np.asarray(out_f32), np.asarray(ref),
                               rtol=1e-4, atol=1e-4)

    # 2) default perf path: bf16 streamed operands, f32 accumulation/output.
    #    Looser tolerance reflects bf16 input rounding, not kernel error.
    out_bf16 = jax.block_until_ready(
        agcn_forward(x, *params, block_n=8, min_pallas_rows=0))
    np.testing.assert_allclose(np.asarray(out_bf16), np.asarray(ref),
                               rtol=5e-2, atol=1e-1)

    # 3) small-N fast path (N=20 < 512 -> plain jnp GEMM, no pallas_call).
    out_fast = jax.block_until_ready(agcn_forward(x, *params))
    np.testing.assert_allclose(np.asarray(out_fast), np.asarray(ref),
                               rtol=5e-2, atol=1e-1)

    print("KERNEL_OK")
</pallas_src>

<mosaic_0001>
module attributes {stable_mosaic.version = 11 : i64} {
  func.func @agcn_kernel(%arg0: i32, %arg1: memref<8x192xf32, #tpu.memory_space<vmem>>, %arg2: memref<192x192xf32, #tpu.memory_space<vmem>>, %arg3: memref<1x192xf32, #tpu.memory_space<vmem>>, %arg4: memref<8x192xf32, #tpu.memory_space<vmem>>) attributes {dimension_semantics = [#tpu.dimension_semantics<parallel>], iteration_bounds = array<i64: 3>, scalar_prefetch = 0 : i64, scratch_operands = 0 : i64, tpu.core_type = #tpu.core_type<tc>, window_params = [{transform_indices = @transform_0, window_bounds = array<i64: 8, 192>}, {pipeline_mode = #tpu.pipeline_mode<synchronous>, transform_indices = @transform_1, window_bounds = array<i64: 192, 192>}, {pipeline_mode = #tpu.pipeline_mode<synchronous>, transform_indices = @transform_2, window_bounds = array<i64: 1, 192>}, {transform_indices = @transform_3, window_bounds = array<i64: 8, 192>}]} {
    %c0 = arith.constant 0 : index
    %c0_0 = arith.constant 0 : index
    %0 = vector.load %arg1[%c0, %c0_0] : memref<8x192xf32, #tpu.memory_space<vmem>>, vector<8x192xf32>
    %c0_1 = arith.constant 0 : index
    %c0_2 = arith.constant 0 : index
    %1 = vector.load %arg2[%c0_1, %c0_2] : memref<192x192xf32, #tpu.memory_space<vmem>>, vector<192x192xf32>
    %cst = arith.constant dense<0.000000e+00> : vector<8x192xf32>
    %2 = tpu.matmul %0, %1, %cst {dimension_numbers = #tpu.dot_dimension_numbers<[1], [0], [0], [1], [0, 0, 1, 1], [], []>} : vector<8x192xf32>, vector<192x192xf32>, vector<8x192xf32> -> vector<8x192xf32>
    %c0_3 = arith.constant 0 : index
    %c0_4 = arith.constant 0 : index
    %3 = vector.load %arg3[%c0_3, %c0_4] : memref<1x192xf32, #tpu.memory_space<vmem>>, vector<1x192xf32>
    %4 = vector.broadcast %3 : vector<1x192xf32> to vector<8x192xf32>
    %5 = arith.addf %2, %4 : vector<8x192xf32>
    %c0_5 = arith.constant 0 : index
    %c0_6 = arith.constant 0 : index
    %6 = vector.load %arg4[%c0_5, %c0_6] : memref<8x192xf32, #tpu.memory_space<vmem>>, vector<8x192xf32>
    tpu.vector_store %arg4[%c0_5, %c0_6], %5 {strides = array<i32>} : memref<8x192xf32, #tpu.memory_space<vmem>>, vector<8x192xf32>,
    return
  }
  func.func @transform_0(%arg0: i32) -> (i32, i32) {
    %c0_i32 = arith.constant 0 : i32
    %c0_i32_0 = arith.constant 0 : i32
    return %arg0, %c0_i32 : i32, i32
  }
  func.func @transform_1(%arg0: i32) -> (i32, i32) {
    %c0_i32 = arith.constant 0 : i32
    %c0_i32_0 = arith.constant 0 : i32
    %c0_i32_1 = arith.constant 0 : i32
    return %c0_i32, %c0_i32_0 : i32, i32
  }
  func.func @transform_2(%arg0: i32) -> (i32, i32) {
    %c0_i32 = arith.constant 0 : i32
    %c0_i32_0 = arith.constant 0 : i32
    %c0_i32_1 = arith.constant 0 : i32
    return %c0_i32, %c0_i32_0 : i32, i32
  }
  func.func @transform_3(%arg0: i32) -> (i32, i32) {
    %c0_i32 = arith.constant 0 : i32
    %c0_i32_0 = arith.constant 0 : i32
    return %arg0, %c0_i32 : i32, i32
  }
}

</mosaic_0001>

<bundles_post_ra>
// kernel: tpu_custom_call.1
= control target key start
LH: loop header
LB: loop body
LE: loop exit
PB: predicated region body
PF: predicated region fallthrough
CT: control target
= control target key end

     0   :  { %8 = vsyncpa [#allocation3], 0  ;;  %s899_s0 = inlined_call_operand.hbm [shape: f32[20,192], index: 0, kind: input, shape index: {}]   ;;  %s900_s1 = inlined_call_operand.hbm [shape: f32[192,192], index: 1, kind: input, shape index: {}]   ;;  %s901_s2 = inlined_call_operand.hbm [shape: f32[1,192], index: 2, kind: input, shape index: {}]   ;;  %s902_s3 = inlined_call_operand.hbm [shape: f32[20,192], index: 3, kind: output, shape index: {}]  }
   0x1   :  { %10 = vsyncpa [#allocation3 + $0x1], 0 }
   0x2   :  { %11 = vsyncpa [#allocation6], 0 }
   0x3   :  { %12 = vsyncpa [#allocation4], 0 }
   0x4   :  { %14 = vsyncpa [#allocation4 + $0x1], 0  ;;  %s745_s12 = smov 0   ;;  %s747_s13 = smov 0  }
   0x5   :  { %s749_s14 = smov 0   ;;  %s751_s15 = smov 0  }
   0x6 LB: > { %s130_s18 = sshll.u32 %s900_s1, 4  ;;  %s769_s19 = sadd.s32 4294967295, %s719_s15   ;;  %s719_s15 = sphi %s751_s15, %s912_s15   ;;  %s715_s14 = sphi %s749_s14, %s911_s14   ;;  %s711_s13 = sphi %s747_s13, %s910_s13   ;;  %s707_s12 = sphi %s745_s12, %s909_s12   ;;  %s131_s18 = int_to_ptr.hbm [resolvable:$true] %s130_s18 }
   0x7   : > { %p469_p0 = scmp.ge.s32.totalorder %s719_s15, 1  ;;  %p41_p1 = scmp.eq.s32.totalorder %s769_s19, 0 }
   0x8   : > { %p119_p2 = scmp.lt.s32.totalorder %s719_s15, 4  ;;  %s721_s21 = smov [#allocation5]  }
   0x9   : > { %s132_s22 = sshll.u32 %s721_s21, 4  ;;  %s145_s25 = sshll.u32 %s901_s2, 4  ;;  %s133_s22 = int_to_ptr.vmem [resolvable:$true] %s132_s22  ;;  %s146_s25 = int_to_ptr.hbm [resolvable:$true] %s145_s25 }
   0xa   : > { %p774_p3 = pnand %p469_p0, %p119_p2  ;;  %s722_s26 = smov [#allocation7]  }
   0xb   : > { %s147_s27 = sshll.u32 %s722_s26, 4  ;;  %s723_s28 = smov 256   ;;  %s148_s27 = int_to_ptr.vmem [resolvable:$true] %s147_s27 }
   0xc   : > { %p502_p4 = pneg %p774_p3  ;;  %s724_s29 = smov 16  }
   0xd   : > { %s468_s30 = sadd.s32 4294967294, %s719_s15   ;;  %s787_s4 = sadd.s32 1, %s719_s15  }
   0xe   : > { %p503_p5 = pnand %p502_p4, %p41_p1  ;;  %s24_s5 = ssub.s32 %s719_s15, %s787_s4 }
   0xf   : > { %s27_s6 = sadd.s32 1, %s715_s14  ;;  %p25_p6 = scmp.eq.s32.totalorder %s24_s5, 0 }
  0x10   : > { %505 = dma.hbm_to_vmem [thread:$0]  (!%p503_p5), %s131_s18, 6144, %s133_s22, [#allocation6], %s723_s28, %s723_s28, %s724_s29  }
  0x11   : > { %508 = dma.hbm_to_vmem [thread:$0]  (!%p503_p5), %s146_s25, 32, %s148_s27, [#allocation6]  }
  0x12   : > { %p34_p7 = scmp.ne.s32.totalorder %s715_s14, %s711_s13  ;;  %p35_p8 = scmp.eq.s32.totalorder %s719_s15, 0 }
  0x13   : > { %p40_p9 = scmp.ne.s32.totalorder %s711_s13, %s707_s12  ;;  %p106_p12 = scmp.eq.s32.totalorder %s769_s19, 2 }
  0x14   : > { %s798_s7 = scalar_select %p25_p6, %s715_s14, %s27_s6  }
  0x15   : > { %p800_p10 = por %p35_p8, %p34_p7  ;;  %p806_p11 = por %p41_p1, %p40_p9 }
  0x16   : > { %p112_p13 = scmp.eq.s32.totalorder %s468_s30, 2  ;;  %p519_p0 = scmp.lt.s32.totalorder %s719_s15, 3 }
  0x17   : > { %s158_s10 = sand.u32 1, %s715_s14   ;;  %p813_p2 = por %p106_p12, %p34_p7 }
  0x18   : > { %p817_p4 = por %p112_p13, %p40_p9  ;;  %s473_s17 = sshll.u32 %s158_s10, 4 }
  0x19   : > { %s488_s18 = sshll.u32 %s719_s15, 4  ;;  %s162_s24 = scalar_lea.vmem [#allocation2], %s473_s17 }
  0x1a   : > { %s167_s23 = scalar_lea.hbm %s899_s0, %s488_s18  ;;  %s171_s25 = sshll.u32 %s162_s24, 4  ;;  %s172_s25 = int_to_ptr.vmem [resolvable:$true] %s171_s25 }
  0x1b   : > { %s169_s26 = sshll.u32 %s167_s23, 4  ;;  %p827_p5 = pnand %p519_p0, %p800_p10  ;;  %s170_s26 = int_to_ptr.hbm [resolvable:$true] %s169_s26 }
  0x1c   : > { %s159_s28 = scalar_lea.sflag [#allocation3], %s158_s10  ;;  %s619_s29 = sshra.s32 %s170_s26, 4  ;;  %s620_s29 = int_to_ptr.hbm [resolvable:$true] %s619_s29 }
  0x1d   : > { %s621_s30 = scalar_lea.hbm %s620_s29, 16  ;;  %p623_p7 = pneg %p827_p5 }
  0x1e   : > { %p622_p6 = scmp.ne.s32.totalorder %s620_s29, %s621_s30  ;;  %s626_s17 = scalar_lea.hbm %s899_s0, 48 }
  0x1f   : > { %p627_p10 = scmp.lt.s32.totalorder %s620_s29, %s899_s0  ;;  %p628_p12 = scmp.lt.s32.totalorder %s626_s17, %s621_s30 }
  0x20   : > { %p624_p8 = pnand %p623_p7, %p622_p6 }
  0x21   : > { %p629_p13 = por %p628_p12, %p627_p10 }
  0x22   : > { %p625_p9 = pneg %p624_p8 }
  0x24   : > { %p630_p0 = pnand %p629_p13, %p625_p9 }
  0x26   : > { %633 = shalt.err (!%p630_p0)
}
  0x27   : > { %512 = dma.hbm_to_vmem [thread:$0]  (!%p827_p5), %s170_s26, 256, %s172_s25, %s159_s28  }
  0x28   : > { %180 = sbr.rel (%p774_p3) target bundleno = 219 (0xdb), region = 32  ;;  %s844_s10 = sand.u32 (!%p774_p3), 1, %s711_s13  }
  0x29   : > { %s477_s21 = sshll.u32 (!%p774_p3), %s844_s10, 4  ;;  %s183_s22 = scalar_lea.sflag (!%p774_p3), [#allocation3], %s844_s10 }
  0x2a   : > { %s850_s23 = scalar_lea.vmem (!%p774_p3), [#allocation2], %s477_s21 }
  0x2d   : > { %694 = dma.done.wait (%p806_p11), %s183_s22, 256  }
  0x2e   : > { %696 = vsyncadd (%p806_p11), %s183_s22, 4294967040 }
  0x2f   : > { %698 = dma.done.wait (%p41_p1), [#allocation6], 6176  }
  0x30   : > { %700 = vsyncadd (%p41_p1), [#allocation6], 4294961120  ;;  %v253_v0 = vld [vmem:[#allocation5 + $0xf8] sm:$0xff]  ;;  %v251_v1 = vld [vmem:[#allocation5 + $0xe8] sm:$0xff]  ;;  %vm276_vm0 = vcmask 523264   ;;  %s489_s20 = sshll.u32 %s769_s19, 4 }
  0x31   : > { %320 = vmatpush.msra.mxu2 %v253_v0  ;;  %v252_v2 = vld [vmem:[#allocation5 + $0xf0] sm:$0xff]  ;;  %v250_v3 = vld [vmem:[#allocation5 + $0xe0] sm:$0xff]  ;;  %v249_v4 = vld [vmem:[#allocation5 + $0xd8] sm:$0xff]  ;;  %s374_s25 = scalar_lea.hbm %s902_s3, %s489_s20  ;;  %s219_s26 = scalar_lea.vmem [#allocation8], %s477_s21 }
  0x32   : > { %280 = vmatpush.msra.mxu0 %v252_v2  ;;  %v248_v5 = vld [vmem:[#allocation5 + $0xd0] sm:$0xff]  ;;  %v247_v6 = vld [vmem:[#allocation5 + $0xc8] sm:$0xff]  ;;  %v246_v7 = vld [vmem:[#allocation5 + $0xc0] sm:$0xff]  ;;  %s376_s27 = sshll.u32 %s219_s26, 4  ;;  %s378_s28 = sshll.u32 %s374_s25, 4  ;;  %s377_s27 = int_to_ptr.vmem [resolvable:$true] %s376_s27  ;;  %s379_s28 = int_to_ptr.hbm [resolvable:$true] %s378_s28 }
  0x33   : > { %321 = vmatpush.msra.mxu2 %v251_v1  ;;  %v269_v8 = vld [vmem:[#allocation5 + $0x178] sm:$0xff]  ;;  %v267_v10 = vld [vmem:[#allocation5 + $0x168] sm:$0xff]  ;;  %v244_v11 = vld [vmem:[#allocation5 + $0xb0] sm:$0xff]  ;;  %s363_s19 = scalar_lea.sflag [#allocation4], %s844_s10  ;;  %s663_s29 = sshra.s32 %s379_s28, 4  ;;  %s664_s29 = int_to_ptr.hbm [resolvable:$true] %s663_s29 }
  0x34   : > { %281 = vmatpush.msra.mxu0 %v250_v3  ;;  %v245_v9 = vld [vmem:[#allocation5 + $0xb8] sm:$0xff]  ;;  %348 = vmatpush.msra.mxu3 %v269_v8  ;;  %v243_v13 = vld [vmem:[#allocation5 + $0xa8] sm:$0xff]  ;;  %v268_v14 = vld [vmem:[#allocation5 + $0x170] sm:$0xff]  ;;  %s665_s30 = scalar_lea.hbm %s664_s29, 16  ;;  %s669_s17 = scalar_lea.hbm %s902_s3, 48 }
  0x35   : > { %322 = vmatpush.msra.mxu2 %v249_v4  ;;  %v265_v12 = vld [vmem:[#allocation5 + $0x158] sm:$0xff]  ;;  %v242_v15 = vld [vmem:[#allocation5 + $0xa0] sm:$0xff]  ;;  %308 = vmatpush.msra.mxu1 %v268_v14  ;;  %v263_v16 = vld [vmem:[#allocation5 + $0x148] sm:$0xff]  ;;  %p666_p1 = scmp.ne.s32.totalorder %s664_s29, %s665_s30  ;;  %p670_p5 = scmp.lt.s32.totalorder %s664_s29, %s902_s3 }
  0x36   : > { %282 = vmatpush.msra.mxu0 %v248_v5  ;;  %349 = vmatpush.msra.mxu3 %v267_v10  ;;  %v266_v17 = vld [vmem:[#allocation5 + $0x160] sm:$0xff]  ;;  %v241_v18 = vld [vmem:[#allocation5 + $0x98] sm:$0xff]  ;;  %v240_v19 = vld [vmem:[#allocation5 + $0x90] sm:$0xff]  ;;  %p671_p6 = scmp.lt.s32.totalorder %s669_s17, %s665_s30 }
  0x37   : > { %323 = vmatpush.msra.mxu2 %v247_v6  ;;  %309 = vmatpush.msra.mxu1 %v266_v17  ;;  %v261_v20 = vld [vmem:[#allocation5 + $0x138] sm:$0xff]  ;;  %v264_v21 = vld [vmem:[#allocation5 + $0x150] sm:$0xff]  ;;  %v239_v22 = vld [vmem:[#allocation5 + $0x88] sm:$0xff]  ;;  %p667_p3 = pnand %p666_p1, %p813_p2 }
  0x38   : > { %283 = vmatpush.msra.mxu0 %v246_v7  ;;  %350 = vmatpush.msra.mxu3 %v265_v12  ;;  %v262_v23 = vld [vmem:[#allocation5 + $0x140] sm:$0xff]  ;;  %v259_v25 = vld [vmem:[#allocation5 + $0x128] sm:$0xff]  ;;  %v237_v26 = vld [vmem:[#allocation5 + $0x78] sm:$0xff]  ;;  %p672_p7 = por %p671_p6, %p670_p5 }
  0x39   : > { %324 = vmatpush.msra.mxu2 %v245_v9  ;;  %v238_v24 = vld [vmem:[#allocation5 + $0x80] sm:$0xff]  ;;  %310 = vmatpush.msra.mxu1 %v264_v21  ;;  %v260_v27 = vld [vmem:[#allocation5 + $0x130] sm:$0xff]  ;;  %v257_v29 = vld [vmem:[#allocation5 + $0x118] sm:$0xff]  ;;  %p668_p11 = pneg %p667_p3 }
  0x3a   : > { %284 = vmatpush.msra.mxu0 %v244_v11  ;;  %351 = vmatpush.msra.mxu3 %v263_v16  ;;  %v236_v28 = vld [vmem:[#allocation5 + $0x70] sm:$0xff]  ;;  %v235_v30 = vld [vmem:[#allocation5 + $0x68] sm:$0xff]  ;;  %v258_v31 = vld [vmem:[#allocation5 + $0x120] sm:$0xff] }
  0x3b   : > { %325 = vmatpush.msra.mxu2 %v243_v13  ;;  %311 = vmatpush.msra.mxu1 %v262_v23  ;;  %v234_v32 = vld [vmem:[#allocation5 + $0x60] sm:$0xff]  ;;  %v255_v33 = vld [vmem:[#allocation5 + $0x108] sm:$0xff]  ;;  %v233_v34 = vld [vmem:[#allocation5 + $0x58] sm:$0xff]  ;;  %p673_p8 = pnand %p672_p7, %p668_p11 }
  0x3c   : > { %285 = vmatpush.msra.mxu0 %v242_v15  ;;  %352 = vmatpush.msra.mxu3 %v261_v20  ;;  %v221_v35 = vld [vmem:[%s850_s23 + $0x8] sm:$0xff]  ;;  %v232_v36 = vld [vmem:[#allocation5 + $0x50] sm:$0xff]  ;;  %v230_v39 = vld [vmem:[#allocation5 + $0x40] sm:$0xff] }
  0x3d   : > { %326 = vmatpush.msra.mxu2 %v241_v18  ;;  %312 = vmatpush.msra.mxu1 %v260_v27  ;;  %v256_v37 = vld [vmem:[#allocation5 + $0x110] sm:$0xff]  ;;  %v231_v38 = vld [vmem:[#allocation5 + $0x48] sm:$0xff]  ;;  %v254_v40 = vld [vmem:[#allocation5 + $0x100] sm:$0xff] }
  0x3e   : > { %286 = vmatpush.msra.mxu0 %v240_v19  ;;  %353 = vmatpush.msra.mxu3 %v259_v25  ;;  %v229_v41 = vld [vmem:[#allocation5 + $0x38] sm:$0xff]  ;;  %v228_v42 = vld [vmem:[#allocation5 + $0x30] sm:$0xff]  ;;  %v227_v43 = vld [vmem:[#allocation5 + $0x28] sm:$0xff] }
  0x3f   : > { %327 = vmatpush.msra.mxu2 %v239_v22  ;;  %313 = vmatpush.msra.mxu1 %v258_v31  ;;  %v226_v44 = vld [vmem:[#allocation5 + $0x20] sm:$0xff]  ;;  %v225_v45 = vld [vmem:[#allocation5 + $0x18] sm:$0xff]  ;;  %v224_v46 = vld [vmem:[#allocation5 + $0x10] sm:$0xff] }
  0x40   : > { %287 = vmatpush.msra.mxu0 %v238_v24  ;;  %354 = vmatpush.msra.mxu3 %v257_v29  ;;  %v223_v47 = vld [vmem:[#allocation5 + $0x8] sm:$0xff]  ;;  %v220_v48 = vld [vmem:[%s850_s23] sm:$0xff] }
  0x41   : > { %328 = vmatpush.msra.mxu2 %v237_v26  ;;  %314 = vmatpush.msra.mxu1 %v256_v37  ;;  %v222_v49 = vld [vmem:[#allocation5] sm:$0xff] }
  0x42   : > { %288 = vmatpush.msra.mxu0 %v236_v28  ;;  %355 = vmatpush.msra.mxu3 %v255_v33  ;;  %v270_v50 = vld [vmem:[#allocation7] sm:$0x3] }
  0x43   : > { %329 = vmatpush.msra.mxu2 %v235_v30  ;;  %482 = vmatmul.msk.f32.vlgmr.msra.gmra.mxu3 %vm276_vm0, %v221_v35  ;;  %v272_v51 = vperm.slane %v270_v50, 0  ;;  %v273_v55 = vperm.slane %v270_v50, 1 }
  0x44   : > { %289 = vmatpush.msra.mxu0 %v234_v32  ;;  %315 = vmatpush.msra.mxu1 %v254_v40 }
  0x45   : > { %330 = vmatpush.msra.mxu2 %v233_v34  ;;  %481 = vmatmul.msk.f32.vlgmr.msra.gmra.mxu1 %vm276_vm0, %v221_v35 }
  0x46   : > { %290 = vmatpush.msra.mxu0 %v232_v36 }
  0x47   : > { %331 = vmatpush.msra.mxu2 %v231_v38 }
  0x48   : > { %291 = vmatpush.msra.mxu0 %v230_v39 }
  0x49   : > { %332 = vmatpush.msra.mxu2 %v229_v41 }
  0x4a   : > { %292 = vmatpush.msra.mxu0 %v228_v42 }
  0x4b   : > { %333 = vmatpush.msra.mxu2 %v227_v43 }
  0x4c   : > { %293 = vmatpush.msra.mxu0 %v226_v44 }
  0x4d   : > { %334 = vmatpush.msra.mxu2 %v225_v45 }
  0x4e   : > { %294 = vmatpush.msra.mxu0 %v224_v46 }
  0x4f   : > { %335 = vmatpush.msra.mxu2 %v223_v47 }
  0x50   : > { %336 = vmatmul.f32.vlgmr.msra.gmra.mxu2 %v220_v48  ;;  %295 = vmatpush.msra.mxu0 %v222_v49 }
  0x51   : > { %296 = vmatmul.f32.vlgmr.msra.gmra.mxu0 %v220_v48 }
  0xc2   : > { %v317_v53 = vpop.f32.mrf.mxu1 }
  0xc6   : > { %v357_v58 = vpop.f32.mrf.mxu3 }
  0xce   : > { %v297_v52 = vpop.f32.mrf.mxu0 }
  0xcf   : > { %v298_v54 = vadd.f32 %v297_v52, %v272_v51 }
  0xd1   : > { %v318_v56 = vadd.f32 %v317_v53, %v298_v54 }
  0xd3   : > { %v337_v57 = vpop.f32.mrf.mxu2  ;;  %360 = vst [vmem:[%s219_s26] sm:$0xff] %v318_v56 }
  0xd4   : > { %v338_v59 = vadd.f32 %v337_v57, %v273_v55 }
  0xd6   : > { %v358_v60 = vadd.f32 %v357_v58, %v338_v59 }
  0xd8   : > { %361 = vst.msk [vmem:[%s219_s26 + $0x8] sm:$0xff] %vm276_vm0, %v358_v60 }
  0xd9   : > { %676 = shalt.err (!%p673_p8)
}
  0xda   : > { %500 = dma.vmem_to_hbm [thread:$0]  (%p813_p2), %s377_s27, 256, %s379_s28, %s363_s19  }
  0xdb PF: > { %p522_p9 = scmp.ge.s32.totalorder %s719_s15, 2  ;;  %s390_s10 = sand.u32 1, %s707_s12  }
  0xdc   : > { %s391_s21 = scalar_lea.sflag [#allocation4], %s390_s10 }
  0xdd   : > { %p514_p10 = pnand %p522_p9, %p817_p4 }
  0xdf   : > { %p515_p12 = pneg %p514_p10 }
  0xe1   : > { %702 = dma.done.wait (%p515_p12), %s391_s21, 256  }
  0xe2   : > { %704 = vsyncadd (%p515_p12), %s391_s21, 4294967040  ;;  %p17_p13 = scmp.ge.s32.totalorder %s787_s4, 5   ;;  %s909_s12 = smov %s711_s13 }
  0xe3   : > { %s910_s13 = smov %s715_s14  ;;  %s911_s14 = smov %s798_s7 }
  0xe4   : > { %s912_s15 = smov %s787_s4  ;;  %19 = sbr.rel (!%p17_p13) target bundleno = 6 (0x6), region = 85 }
  0xe9   :  { %397 = vsyncpa [#allocation3], 1 }
  0xea   :  { %399 = vsyncpa [#allocation3 + $0x1], 1 }
  0xeb   :  { %400 = vsyncpa [#allocation6], 1 }
  0xec   :  { %401 = vsyncpa [#allocation4], 1 }
  0xed   :  { %403 = vsyncpa [#allocation4 + $0x1], 1 }

</bundles_post_ra>
